<compile_context>
chip_gen: v7x
topology: tpu7x:2x2x1
jax: 0.10.0
libtpu: 0.0.40
codegen_flags: <defaults>
</compile_context>

<pallas_src>
import math

import jax
import jax.numpy as jnp
from jax.experimental import pallas as pl
from jax.experimental.pallas import tpu as pltpu


def make_positional_encoding_table(d_model, max_len=5000, dtype=jnp.float32):
    """Same buffer as PositionalEncoding.__init__ (interleaved sin/cos)."""
    position = jnp.arange(max_len, dtype=jnp.float32)[:, None]                 # (L, 1)
    div_term = jnp.exp(jnp.arange(0, d_model, 2, dtype=jnp.float32)
                       * (-math.log(10000.0) / d_model))                       # (D/2,)
    ang = position * div_term                                                  # (L, D/2)
    # stack+reshape interleaves -> pe[:, 0::2] = sin, pe[:, 1::2] = cos
    pe = jnp.stack([jnp.sin(ang), jnp.cos(ang)], axis=-1).reshape(max_len, d_model)
    return pe.astype(dtype)


def _pe_add_kernel(x_ref, pe_ref, o_ref):
    # x_ref: (B, T), pe_ref: (1, T) -> broadcast add over the batch sublanes.
    o_ref[...] = (x_ref[...] + pe_ref[...]).astype(o_ref.dtype)


def _pe_add_dropout_kernel(x_ref, pe_ref, m_ref, o_ref):
    # m_ref is the pre-scaled inverted-dropout mask: 0 where dropped, 1/(1-p) kept.
    o_ref[...] = ((x_ref[...] + pe_ref[...]) * m_ref[...]).astype(o_ref.dtype)


def _flat_tile(F, B, itemsize, cap_bytes=4 * 1024 * 1024):
    """Pick a lane-dense flat tile T (multiple of 128) and padded flat length.

    Block bytes (B * T * itemsize) are capped at ~4 MiB so double-buffered
    x/pe/mask/out tiles stay well inside 64 MiB (v7x) / 128 MiB (v5e/v6e) VMEM.
    """
    m = -(-F // 128)                                   # 128-lane chunks needed
    max_t = max(1, cap_bytes // (B * 128 * itemsize))
    t = min(m, max_t)
    if t == m and m >= 2:
        # Prefer at least 2 grid steps so v7x can split blocks across its 2 TCs.
        t = -(-m // 2)
    n_blocks = -(-m // t)
    T = 128 * t
    return T, T * n_blocks, n_blocks


def positional_encoding_forward(x, pe, *, dropout_p=0.0, training=False, key=None):
    """Equivalent of PositionalEncoding.forward: dropout(x + pe[:seq_len])."""
    B, S, D = x.shape
    assert pe.shape[0] >= S and pe.shape[1] == D
    F = S * D
    itemsize = jnp.dtype(x.dtype).itemsize
    T, F_pad, n_blocks = _flat_tile(F, B, itemsize)

    # Lane-dense flattening: the add/dropout are position-wise, so flattening
    # (S, D) -> (S*D,) is exact and makes the minor dim a multiple of 128 lanes.
    x2 = x.reshape(B, F)
    pe2 = pe[:S].reshape(1, F)            # tiny (S*D) slice of the fixed buffer
    if F_pad != F:
        pad = F_pad - F
        x2 = jnp.pad(x2, ((0, 0), (0, pad)))
        pe2 = jnp.pad(pe2, ((0, 0), (0, pad)))

    p = float(dropout_p)
    use_dropout = bool(training) and p > 0.0

    args = [x2, pe2]
    in_specs = [
        pl.BlockSpec((B, T), lambda i: (0, i)),   # x: (B, T) tile per flat block
        pl.BlockSpec((1, T), lambda i: (0, i)),   # pe: read exactly once overall
    ]
    kernel = _pe_add_kernel

    if use_dropout:
        if key is None:
            key = jax.random.PRNGKey(0)
        if p >= 1.0:
            # PyTorch nn.Dropout(p=1.0) zeroes the output.
            mask2 = jnp.zeros((B, F_pad), x.dtype)
        else:
            keep = jax.random.bernoulli(key, 1.0 - p, (B, F_pad))
            mask2 = keep.astype(x.dtype) * jnp.asarray(1.0 / (1.0 - p), x.dtype)
        args.append(mask2)
        in_specs.append(pl.BlockSpec((B, T), lambda i: (0, i)))
        kernel = _pe_add_dropout_kernel

    out2 = pl.pallas_call(
        kernel,
        out_shape=jax.ShapeDtypeStruct((B, F_pad), x.dtype),
        grid_spec=pltpu.PrefetchScalarGridSpec(
            num_scalar_prefetch=0,
            grid=(n_blocks,),
            in_specs=in_specs,
            out_specs=pl.BlockSpec((B, T), lambda i: (0, i)),
        ),
        compiler_params=pltpu.CompilerParams(
            dimension_semantics=("parallel",),
            vmem_limit_bytes=48 * 1024 * 1024,
        ),
    )(*args)

    if F_pad != F:
        out2 = out2[:, :F]
    return out2.reshape(B, S, D)


if __name__ == "__main__":
    # Small deterministic setup consistent with the module: batch=2, seq=8, d_model=32.
    d_model = 32
    batch, seq = 2, 8
    max_len = 64
    dropout_p = 0.1

    root = jax.random.PRNGKey(0)
    kx, kd = jax.random.split(root)
    x = jax.random.normal(kx, (batch, seq, d_model), dtype=jnp.float32)

    pe = make_positional_encoding_table(d_model, max_len=max_len)

    # --- eval / inference path (dropout is identity) ---
    out = positional_encoding_forward(x, pe, dropout_p=dropout_p, training=False)
    out = jax.block_until_ready(out)

    ref = x + pe[:seq][None, :, :]
    assert out.shape == (batch, seq, d_model)
    assert out.dtype == jnp.float32
    assert jnp.allclose(out, ref, atol=1e-6, rtol=1e-6)

    # --- training path (inverted dropout; mask generated in the wrapper) ---
    out_tr = positional_encoding_forward(
        x, pe, dropout_p=dropout_p, training=True, key=kd)
    out_tr = jax.block_until_ready(out_tr)

    scaled = ref * jnp.float32(1.0 / (1.0 - dropout_p))
    ok = jnp.logical_or(out_tr == 0.0,
                        jnp.isclose(out_tr, scaled, atol=1e-5, rtol=1e-5))
    assert out_tr.shape == (batch, seq, d_model)
    assert bool(jnp.all(ok))

    print("KERNEL_OK")
</pallas_src>

<mosaic_0001>
module attributes {stable_mosaic.version = 11 : i64} {
  func.func @_pe_add_kernel(%arg0: i32, %arg1: memref<2x128xf32, #tpu.memory_space<vmem>>, %arg2: memref<1x128xf32, #tpu.memory_space<vmem>>, %arg3: memref<2x128xf32, #tpu.memory_space<vmem>>) attributes {dimension_semantics = [#tpu.dimension_semantics<parallel>], iteration_bounds = array<i64: 2>, scalar_prefetch = 0 : i64, scratch_operands = 0 : i64, tpu.core_type = #tpu.core_type<tc>, window_params = [{transform_indices = @transform_0, window_bounds = array<i64: 2, 128>}, {transform_indices = @transform_1, window_bounds = array<i64: 1, 128>}, {transform_indices = @transform_2, window_bounds = array<i64: 2, 128>}]} {
    %c0 = arith.constant 0 : index
    %c0_0 = arith.constant 0 : index
    %0 = vector.load %arg1[%c0, %c0_0] : memref<2x128xf32, #tpu.memory_space<vmem>>, vector<2x128xf32>
    %c0_1 = arith.constant 0 : index
    %c0_2 = arith.constant 0 : index
    %1 = vector.load %arg2[%c0_1, %c0_2] : memref<1x128xf32, #tpu.memory_space<vmem>>, vector<1x128xf32>
    %2 = vector.broadcast %1 : vector<1x128xf32> to vector<2x128xf32>
    %3 = arith.addf %0, %2 : vector<2x128xf32>
    %c0_3 = arith.constant 0 : index
    %c0_4 = arith.constant 0 : index
    %4 = vector.load %arg3[%c0_3, %c0_4] : memref<2x128xf32, #tpu.memory_space<vmem>>, vector<2x128xf32>
    tpu.vector_store %arg3[%c0_3, %c0_4], %3 {strides = array<i32>} : memref<2x128xf32, #tpu.memory_space<vmem>>, vector<2x128xf32>,
    return
  }
  func.func @transform_0(%arg0: i32) -> (i32, i32) {
    %c0_i32 = arith.constant 0 : i32
    %c0_i32_0 = arith.constant 0 : i32
    return %c0_i32, %arg0 : i32, i32
  }
  func.func @transform_1(%arg0: i32) -> (i32, i32) {
    %c0_i32 = arith.constant 0 : i32
    %c0_i32_0 = arith.constant 0 : i32
    return %c0_i32, %arg0 : i32, i32
  }
  func.func @transform_2(%arg0: i32) -> (i32, i32) {
    %c0_i32 = arith.constant 0 : i32
    %c0_i32_0 = arith.constant 0 : i32
    return %c0_i32, %arg0 : i32, i32
  }
}

</mosaic_0001>

<bundles_post_ra>
// kernel: tpu_custom_call.1
= control target key start
LH: loop header
LB: loop body
LE: loop exit
PB: predicated region body
PF: predicated region fallthrough
CT: control target
= control target key end

     0   :  { %7 = vsyncpa [#allocation3], 0  ;;  %s616_s0 = inlined_call_operand.hbm [shape: f32[2,256], index: 0, kind: input, shape index: {}]   ;;  %s617_s1 = inlined_call_operand.vmem [shape: f32[1,256], index: 1, kind: input, shape index: {}]   ;;  %s618_s2 = inlined_call_operand.hbm [shape: f32[2,256], index: 2, kind: output, shape index: {}]  }
   0x1   :  { %9 = vsyncpa [#allocation3 + $0x1], 0 }
   0x2   :  { %10 = vsyncpa [#allocation4], 0 }
   0x3   :  { %12 = vsyncpa [#allocation4 + $0x1], 0  ;;  %s450_s9 = smov 0   ;;  %s452_s10 = smov 0  }
   0x4   :  { %s454_s11 = smov 0   ;;  %s456_s12 = smov 0  }
   0x5 LB: > { %s471_s13 = sadd.s32 4294967295, %s431_s12   ;;  %s276_s14 = sadd.s32 4294967294, %s431_s12   ;;  %s431_s12 = sphi %s456_s12, %s633_s12   ;;  %s427_s11 = sphi %s454_s11, %s632_s11   ;;  %s423_s10 = sphi %s452_s10, %s631_s10   ;;  %s419_s9 = sphi %s450_s9, %s630_s9  }
   0x6   : > { %s475_s15 = sadd.s32 1, %s431_s12   ;;  %s25_s16 = sadd.s32 1, %s427_s11 }
   0x7   : > { %s22_s17 = ssub.s32 %s431_s12, %s475_s15  ;;  %p32_p0 = scmp.ne.s32.totalorder %s427_s11, %s423_s10 }
   0x8   : > { %p23_p1 = scmp.eq.s32.totalorder %s22_s17, 0  ;;  %p33_p2 = scmp.eq.s32.totalorder %s431_s12, 0 }
   0x9   : > { %p38_p3 = scmp.ne.s32.totalorder %s423_s10, %s419_s9  ;;  %p39_p4 = scmp.eq.s32.totalorder %s471_s13, 0 }
   0xa   : > { %s487_s18 = scalar_select %p23_p1, %s427_s11, %s25_s16  }
   0xb   : > { %p489_p5 = por %p33_p2, %p32_p0  ;;  %p493_p6 = por %p39_p4, %p38_p3 }
   0xc   : > { %p88_p7 = scmp.eq.s32.totalorder %s471_s13, 1  ;;  %p94_p8 = scmp.eq.s32.totalorder %s276_s14, 1 }
   0xd   : > { %p301_p10 = scmp.lt.s32.totalorder %s431_s12, 2  ;;  %s114_s23 = sand.u32 1, %s427_s11  }
   0xe   : > { %p500_p11 = por %p88_p7, %p32_p0  ;;  %p504_p12 = por %p94_p8, %p38_p3 }
   0xf   : > { %s280_s24 = sshll.u32 %s431_s12, 5  ;;  %s279_s25 = sshll.u32 %s114_s23, 1 }
  0x10   : > { %s622_s21 = scalar_select %p500_p11, 1, 0 }
  0x11   : > { %s623_s22 = scalar_select %p504_p12, 1, 0 }
  0x12   : > { %s513_s28 = scalar_lea.hbm %s616_s0, %s280_s24  ;;  %s118_s29 = scalar_lea.vmem [#allocation2], %s279_s25 }
  0x13   : > { %s125_s30 = sshll.u32 %s118_s29, 4  ;;  %p517_p13 = pnand %p301_p10, %p489_p5  ;;  %s521_s30 = int_to_ptr.vmem [resolvable:$true] %s125_s30 }
  0x14   : > { %s115_s4 = scalar_lea.sflag [#allocation3], %s114_s23  ;;  %s335_s5 = scalar_lea.hbm %s513_s28, 32 }
  0x15   : > { %p336_p2 = scmp.ne.s32.totalorder %s513_s28, %s335_s5  ;;  %p337_p3 = pneg %p517_p13 }
  0x16   : > { %s340_s8 = scalar_lea.hbm %s616_s0, 64  ;;  %p341_p5 = scmp.lt.u32.totalorder %s513_s28, %s616_s0 }
  0x17   : > { %p338_p4 = pnand %p337_p3, %p336_p2  ;;  %p342_p8 = scmp.lt.u32.totalorder %s340_s8, %s335_s5 }
  0x18   : > { %p344_p9 = scmp.lt.u32.totalorder %s335_s5, %s513_s28 }
  0x19   : > { %p339_p7 = pneg %p338_p4  ;;  %p343_p10 = por %p342_p8, %p341_p5 }
  0x1b   : > { %p345_p0 = por %p344_p9, %p343_p10 }
  0x1d   : > { %p346_p1 = pnand %p345_p0, %p339_p7 }
  0x1f   : > { %349 = shalt.err (!%p346_p1)
}
  0x20   : > { %s350_s17 = scalar_lea.vmem %s521_s30, 32  ;;  %s433_s19 = smov [#allocation2]  }
  0x21   : > { %p351_p2 = scmp.ne.s32.totalorder %s521_s30, %s350_s17  ;;  %s355_s23 = sshll.u32 %s433_s19, 4  ;;  %s356_s23 = int_to_ptr.vmem [resolvable:$false] %s355_s23 }
  0x22   : > { %s357_s24 = scalar_lea.vmem %s356_s23, 64  ;;  %p358_p11 = scmp.lt.s32.totalorder %s521_s30, %s356_s23 }
  0x23   : > { %p353_p4 = pnand %p351_p2, %p337_p3  ;;  %p359_p5 = scmp.lt.s32.totalorder %s357_s24, %s350_s17 }
  0x25   : > { %p354_p12 = pneg %p353_p4  ;;  %p360_p8 = por %p359_p5, %p358_p11 }
  0x27   : > { %p361_p9 = pnand %p360_p8, %p354_p12 }
  0x29   : > { %364 = shalt.err (!%p361_p9)
}
  0x2a   : > { %296 = dma.hbm_to_vmem [thread:$0]  (!%p517_p13), %s513_s28, 32, %s521_s30, %s115_s4  }
  0x2b   : > { %p625_p0 = scmp.lt.s32.totalorder %s431_s12, 3  ;;  %p626_p1 = scmp.ge.s32.totalorder %s431_s12, 1 }
  0x2d   : > { %p137_p3 = pnand %p626_p1, %p625_p0 }
  0x2e   : > { %s555_s25 = sand.u32 (!%p137_p3), 1, %s423_s10  }
  0x2f   : > { %140 = sbr.rel (%p137_p3) target bundleno = 83 (0x53), region = 28  ;;  %s282_s26 = sshll.u32 (!%p137_p3), %s555_s25, 1 }
  0x30   : > { %s143_s27 = scalar_lea.sflag (!%p137_p3), [#allocation3], %s555_s25  ;;  %s146_s29 = scalar_lea.vmem (!%p137_p3), [#allocation2], %s282_s26 }
  0x36   : > { %410 = dma.done.wait (%p493_p6), %s143_s27, 32  }
  0x37   : > { %412 = vsyncadd (%p493_p6), %s143_s27, 4294967264  ;;  %p170_p11 = scmp.lt.s32.totalorder %s471_s13, 1  ;;  %s169_s5 = scalar_lea.vmem [#allocation5], %s282_s26  ;;  %v173_v0 = vld [vmem:[%s146_s29] sm:$0x3] }
  0x38   : > { %s197_s6 = sshll.u32 %s169_s5, 4  ;;  %s286_s7 = sshll.u32 %s471_s13, 5  ;;  %s569_s6 = int_to_ptr.vmem [resolvable:$true] %s197_s6 }
  0x39   : > { %s171_s28 = scalar_select %p170_p11, %s471_s13, 1 }
  0x3a   : > { %s574_s14 = scalar_lea.hbm %s618_s2, %s286_s7  ;;  %s184_s16 = scalar_lea.sflag [#allocation4], %s555_s25 }
  0x3b   : > { %s172_s4 = scalar_lea.vmem %s617_s1, %s171_s28  ;;  %s365_s17 = scalar_lea.vmem %s569_s6, 32 }
  0x3c   : > { %v284_v1 = vld [vmem:[%s172_s4] ss:$0 sm:$0xff]  ;;  %p366_p6 = scmp.ne.s32.totalorder %s569_s6, %s365_s17  ;;  %p627_p12 = scmp.ne.s32.totalorder %s622_s21, 0 }
  0x3d   : > { %v181_v2 = vadd.f32 %v284_v1, %v173_v0  ;;  %s434_s13 = smov [#allocation5]  }
  0x3e   : > { %p367_p13 = pnand %p366_p6, %p627_p12  ;;  %s369_s19 = sshll.u32 %s434_s13, 4  ;;  %s370_s19 = int_to_ptr.vmem [resolvable:$false] %s369_s19 }
  0x3f   : > { %182 = vst [vmem:[%s169_s5] sm:$0x3] %v181_v2  ;;  %s371_s23 = scalar_lea.vmem %s370_s19, 64  ;;  %p372_p10 = scmp.lt.s32.totalorder %s569_s6, %s370_s19 }
  0x40   : > { %p368_p7 = pneg %p367_p13  ;;  %p373_p2 = scmp.lt.s32.totalorder %s371_s23, %s365_s17 }
  0x42   : > { %p374_p4 = por %p373_p2, %p372_p10 }
  0x44   : > { %p375_p5 = pnand %p374_p4, %p368_p7 }
  0x46   : > { %378 = shalt.err (!%p375_p5)
}
  0x47   : > { %s379_s24 = scalar_lea.hbm %s574_s14, 32  ;;  %s383_s27 = scalar_lea.hbm %s618_s2, 64 }
  0x48   : > { %p380_p8 = scmp.ne.s32.totalorder %s574_s14, %s379_s24  ;;  %p384_p1 = scmp.lt.u32.totalorder %s574_s14, %s618_s2 }
  0x49   : > { %p385_p3 = scmp.lt.u32.totalorder %s383_s27, %s379_s24  ;;  %p387_p6 = scmp.lt.u32.totalorder %s379_s24, %s574_s14 }
  0x4a   : > { %p381_p9 = pnand %p380_p8, %p627_p12 }
  0x4b   : > { %p386_p11 = por %p385_p3, %p384_p1 }
  0x4c   : > { %p382_p0 = pneg %p381_p9 }
  0x4d   : > { %p388_p13 = por %p387_p6, %p386_p11 }
  0x4f   : > { %p389_p7 = pnand %p388_p13, %p382_p0 }
  0x51   : > { %392 = shalt.err (!%p389_p7)
}
  0x52   : > { %291 = dma.vmem_to_hbm [thread:$0]  (%p627_p12), %s569_s6, 32, %s574_s14, %s184_s16  }
  0x53 PF: > { %s209_s30 = sand.u32 1, %s419_s9   ;;  %p628_p10 = scmp.ne.s32.totalorder %s623_s22, 0 }
  0x54   : > { %p629_p2 = scmp.ge.s32.totalorder %s431_s12, 2  ;;  %s210_s3 = scalar_lea.sflag [#allocation4], %s209_s30 }
  0x56   : > { %p298_p4 = pnand %p629_p2, %p628_p10 }
  0x58   : > { %414 = dma.done.wait (!%p298_p4), %s210_s3, 32  }
  0x59   : > { %416 = vsyncadd (!%p298_p4), %s210_s3, 4294967264  ;;  %p15_p5 = scmp.ge.s32.totalorder %s475_s15, 4   ;;  %s630_s9 = smov %s423_s10 }
  0x5a   : > { %s631_s10 = smov %s427_s11  ;;  %s632_s11 = smov %s487_s18 }
  0x5b   : > { %s633_s12 = smov %s475_s15  ;;  %17 = sbr.rel (!%p15_p5) target bundleno = 5 (0x5), region = 76 }
  0x62   :  { %215 = vsyncpa [#allocation3], 1 }
  0x63   :  { %217 = vsyncpa [#allocation3 + $0x1], 1 }
  0x64   :  { %218 = vsyncpa [#allocation4], 1 }
  0x65   :  { %220 = vsyncpa [#allocation4 + $0x1], 1 }

</bundles_post_ra>
